<compile_context>
chip_gen: v6e
topology: v6e:2x2x1
jax: 0.10.0
libtpu: 0.0.40
codegen_flags: <defaults>
</compile_context>

<pallas_src>
import jax
import jax.numpy as jnp
from jax import lax
from jax.experimental import pallas as pl
from jax.experimental.pallas import tpu as pltpu

INPUT_SIZE = 1
HIDDEN = 32


def rnn_kernel(x_ref, h0_ref, wpack_ref, out_ref):
    # x_ref:     (B, T)        batch-first input, INPUT_SIZE==1 squeezed away
    # h0_ref:    (B, H)
    # wpack_ref: (H+8, H+1)    rows 0:H       = [W_hh^T | W_out^T]   (fused recurrence+output weight)
    #                          row  H,   0:H  = W_ih^T (I == 1 -> one row)
    #                          row  H+1, 0:H  = b_ih + b_hh
    #                          row  H+2, 0:H  = W_out (Linear(32,1) weight)
    #                          row  H+3, 0    = b_out
    # out_ref:   (B, T+H)      columns 0:T = per-timestep Linear output, T:T+H = final hidden
    B, T = x_ref.shape
    H = HIDDEN

    w_rec = wpack_ref[0:H, :]              # (H, H+1)
    w_ih = wpack_ref[H:H + 1, 0:H]         # (1, H)
    b = wpack_ref[H + 1:H + 2, 0:H]        # (1, H)
    w_out = wpack_ref[H + 2:H + 3, 0:H]    # (1, H)
    b_out = wpack_ref[H + 3:H + 4, 0:1]    # (1, 1)

    x = x_ref[...]                         # (B, T)

    # Hoisted input projection, one fused op (I == 1 -> pure broadcast mul, no MXU).
    # Independent of the recurrence, so all of it sits off the serial critical path.
    px = x[:, :, None] * w_ih[None, :, :] + b[None, :, :]      # (B, T, H)

    # Serial recurrence, fully unrolled (T small & static). Each step's matmul against
    # the fused [W_hh^T | W_out^T] also produces the PREVIOUS timestep's Linear output
    # in lane H for free (tanh is applied to lanes 0:H only).
    h = h0_ref[...]                        # (B, H)
    ys = []
    for t in range(T):
        z = jnp.dot(h, w_rec, preferred_element_type=jnp.float32)   # (B, H+1)
        if t > 0:
            ys.append(z[:, H:H + 1])       # y_{t-1} - b_out, free from the fused matmul
        h = jnp.tanh(px[:, t, :] + z[:, 0:H])
    # Last timestep's output: one 32-wide lane reduce, off the chain tail.
    ys.append(jnp.sum(h * w_out, axis=-1, keepdims=True))            # (B, 1)

    y = jnp.concatenate(ys, axis=1) + b_out                          # (B, T)
    # Single dense store: y and h_T packed into one (B, T+H) output tile.
    out_ref[...] = jnp.concatenate([y, h], axis=1).astype(out_ref.dtype)


def pack_params(params):
    """Pack all static weights into one (H+8, H+1) f32 array -> one input DMA."""
    H = HIDDEN
    w_rec = jnp.concatenate([params["w_hh"], params["w_out"].T], axis=1)   # (H, H+1)
    rows = jnp.zeros((8, H + 1), jnp.float32)
    rows = rows.at[0, :H].set(params["w_ih"][0])
    rows = rows.at[1, :H].set(params["b"][0])
    rows = rows.at[2, :H].set(params["w_out"][0])
    rows = rows.at[3, 0].set(params["b_out"][0, 0])
    return jnp.concatenate([w_rec, rows], axis=0)                          # (H+8, H+1)


def rnn_forward(x_btf, h_state, wpack):
    """x_btf: (B, T, INPUT_SIZE) batch-first; h_state: (1, B, H) or None.

    Returns (y, h) with y: (B, T, 1), h: (1, B, H) — same as the PyTorch module.
    """
    B, T, I = x_btf.shape
    assert I == INPUT_SIZE
    H = HIDDEN
    if h_state is None:
        h0 = jnp.zeros((B, H), jnp.float32)
    else:
        h0 = h_state[0].astype(jnp.float32)

    x_bt = x_btf[:, :, 0].astype(jnp.float32)        # (B, T), no transpose needed

    vmem = pl.BlockSpec(memory_space=pltpu.MemorySpace.VMEM)

    out = pl.pallas_call(
        rnn_kernel,
        out_shape=jax.ShapeDtypeStruct((B, T + H), jnp.float32),
        in_specs=[vmem, vmem, vmem],
        out_specs=vmem,
    )(x_bt, h0, wpack)

    y = out[:, :T, None]                 # (B, T, 1) — cheap wrapper slice/reshape
    h_out = out[None, :, T:]             # (1, B, H) like PyTorch
    return y, h_out


def init_params(key):
    # PyTorch default init: uniform(-1/sqrt(fan), 1/sqrt(fan));
    # fan == HIDDEN for both the RNN cell and the Linear(32, 1) head.
    H, I = HIDDEN, INPUT_SIZE
    k = 1.0 / jnp.sqrt(jnp.float32(H))
    ks = jax.random.split(key, 6)
    w_ih = jax.random.uniform(ks[0], (I, H), jnp.float32, -k, k)    # = W_ih^T  (I == 1)
    w_hh = jax.random.uniform(ks[1], (H, H), jnp.float32, -k, k)    # = W_hh^T
    b_ih = jax.random.uniform(ks[2], (H,), jnp.float32, -k, k)
    b_hh = jax.random.uniform(ks[3], (H,), jnp.float32, -k, k)
    w_out = jax.random.uniform(ks[4], (1, H), jnp.float32, -k, k)   # = Linear(32,1) weight
    b_out = jax.random.uniform(ks[5], (1,), jnp.float32, -k, k)
    return {
        "w_ih": w_ih,
        "w_hh": w_hh,
        "b": (b_ih + b_hh)[None, :],     # (1, H)
        "w_out": w_out,                  # (1, H)
        "b_out": b_out[None, :],         # (1, 1)
    }


def rnn_forward_ref(x_btf, h_state, params):
    """Pure-JAX reference (same math as torch.nn.RNN + per-step Linear)."""
    B, T, I = x_btf.shape
    h = jnp.zeros((B, HIDDEN), jnp.float32) if h_state is None else h_state[0]

    def step(h, x_t):                    # x_t: (B, I)
        h_new = jnp.tanh(x_t @ params["w_ih"] + h @ params["w_hh"] + params["b"])
        y_t = h_new @ params["w_out"].T + params["b_out"]          # (B, 1)
        return h_new, y_t

    h_T, ys = lax.scan(step, h, jnp.transpose(x_btf, (1, 0, 2)))
    return jnp.transpose(ys, (1, 0, 2)), h_T[None]


if __name__ == "__main__":
    key = jax.random.PRNGKey(0)
    pkey, xkey = jax.random.split(key)
    params = init_params(pkey)
    wpack = pack_params(params)

    B, T = 2, 8
    x = jax.random.normal(xkey, (B, T, INPUT_SIZE), jnp.float32)
    h_state = None  # as in the original training loop's first call

    y, h_out = rnn_forward(x, h_state, wpack)
    y = jax.block_until_ready(y)
    h_out = jax.block_until_ready(h_out)

    y_ref, h_ref = rnn_forward_ref(x, h_state, params)
    assert y.shape == (B, T, 1) and h_out.shape == (1, B, HIDDEN)
    assert jnp.allclose(y, y_ref, atol=1e-5, rtol=1e-5)
    assert jnp.allclose(h_out, h_ref, atol=1e-5, rtol=1e-5)

    print("KERNEL_OK")
</pallas_src>

<mosaic_0001>
module attributes {stable_mosaic.version = 11 : i64} {
  func.func @rnn_kernel(%arg0: memref<2x8xf32, #tpu.memory_space<vmem>>, %arg1: memref<2x32xf32, #tpu.memory_space<vmem>>, %arg2: memref<40x33xf32, #tpu.memory_space<vmem>>, %arg3: memref<2x40xf32, #tpu.memory_space<vmem>>) attributes {dimension_semantics = [], scalar_prefetch = 0 : i64, scratch_operands = 0 : i64, tpu.core_type = #tpu.core_type<tc>} {
    %c0 = arith.constant 0 : index
    %c0_0 = arith.constant 0 : index
    %0 = vector.load %arg2[%c0, %c0_0] : memref<40x33xf32, #tpu.memory_space<vmem>>, vector<32x33xf32>
    %c32 = arith.constant 32 : index
    %c0_1 = arith.constant 0 : index
    %1 = vector.load %arg2[%c32, %c0_1] : memref<40x33xf32, #tpu.memory_space<vmem>>, vector<1x32xf32>
    %c33 = arith.constant 33 : index
    %c0_2 = arith.constant 0 : index
    %2 = vector.load %arg2[%c33, %c0_2] : memref<40x33xf32, #tpu.memory_space<vmem>>, vector<1x32xf32>
    %c34 = arith.constant 34 : index
    %c0_3 = arith.constant 0 : index
    %3 = vector.load %arg2[%c34, %c0_3] : memref<40x33xf32, #tpu.memory_space<vmem>>, vector<1x32xf32>
    %c35 = arith.constant 35 : index
    %c0_4 = arith.constant 0 : index
    %4 = vector.load %arg2[%c35, %c0_4] : memref<40x33xf32, #tpu.memory_space<vmem>>, vector<1x1xf32>
    %c0_5 = arith.constant 0 : index
    %c0_6 = arith.constant 0 : index
    %5 = vector.load %arg0[%c0_5, %c0_6] : memref<2x8xf32, #tpu.memory_space<vmem>>, vector<2x8xf32>
    %6 = vector.shape_cast %5 : vector<2x8xf32> to vector<2x8x1xf32>
    %7 = vector.shape_cast %1 : vector<1x32xf32> to vector<1x1x32xf32>
    %8 = vector.broadcast %6 : vector<2x8x1xf32> to vector<2x8x32xf32>
    %9 = vector.broadcast %7 : vector<1x1x32xf32> to vector<2x8x32xf32>
    %10 = arith.mulf %8, %9 : vector<2x8x32xf32>
    %11 = vector.shape_cast %2 : vector<1x32xf32> to vector<1x1x32xf32>
    %12 = vector.broadcast %11 : vector<1x1x32xf32> to vector<2x8x32xf32>
    %13 = arith.addf %10, %12 : vector<2x8x32xf32>
    %c0_7 = arith.constant 0 : index
    %c0_8 = arith.constant 0 : index
    %14 = vector.load %arg1[%c0_7, %c0_8] : memref<2x32xf32, #tpu.memory_space<vmem>>, vector<2x32xf32>
    %cst = arith.constant dense<0.000000e+00> : vector<2x33xf32>
    %15 = tpu.matmul %14, %0, %cst {dimension_numbers = #tpu.dot_dimension_numbers<[1], [0], [0], [1], [0, 0, 1, 1], [], []>} : vector<2x32xf32>, vector<32x33xf32>, vector<2x33xf32> -> vector<2x33xf32>
    %16 = vector.extract_strided_slice %13 {offsets = [0, 0, 0], sizes = [2, 1, 32], strides = [1, 1, 1]} : vector<2x8x32xf32> to vector<2x1x32xf32>
    %17 = vector.shape_cast %16 : vector<2x1x32xf32> to vector<2x32xf32>
    %18 = vector.extract_strided_slice %15 {offsets = [0, 0], sizes = [2, 32], strides = [1, 1]} : vector<2x33xf32> to vector<2x32xf32>
    %19 = arith.addf %17, %18 : vector<2x32xf32>
    %20 = math.tanh %19 : vector<2x32xf32>
    %cst_9 = arith.constant dense<0.000000e+00> : vector<2x33xf32>
    %21 = tpu.matmul %20, %0, %cst_9 {dimension_numbers = #tpu.dot_dimension_numbers<[1], [0], [0], [1], [0, 0, 1, 1], [], []>} : vector<2x32xf32>, vector<32x33xf32>, vector<2x33xf32> -> vector<2x33xf32>
    %22 = vector.extract_strided_slice %21 {offsets = [0, 32], sizes = [2, 1], strides = [1, 1]} : vector<2x33xf32> to vector<2x1xf32>
    %23 = vector.extract_strided_slice %13 {offsets = [0, 1, 0], sizes = [2, 1, 32], strides = [1, 1, 1]} : vector<2x8x32xf32> to vector<2x1x32xf32>
    %24 = vector.shape_cast %23 : vector<2x1x32xf32> to vector<2x32xf32>
    %25 = vector.extract_strided_slice %21 {offsets = [0, 0], sizes = [2, 32], strides = [1, 1]} : vector<2x33xf32> to vector<2x32xf32>
    %26 = arith.addf %24, %25 : vector<2x32xf32>
    %27 = math.tanh %26 : vector<2x32xf32>
    %cst_10 = arith.constant dense<0.000000e+00> : vector<2x33xf32>
    %28 = tpu.matmul %27, %0, %cst_10 {dimension_numbers = #tpu.dot_dimension_numbers<[1], [0], [0], [1], [0, 0, 1, 1], [], []>} : vector<2x32xf32>, vector<32x33xf32>, vector<2x33xf32> -> vector<2x33xf32>
    %29 = vector.extract_strided_slice %28 {offsets = [0, 32], sizes = [2, 1], strides = [1, 1]} : vector<2x33xf32> to vector<2x1xf32>
    %30 = vector.extract_strided_slice %13 {offsets = [0, 2, 0], sizes = [2, 1, 32], strides = [1, 1, 1]} : vector<2x8x32xf32> to vector<2x1x32xf32>
    %31 = vector.shape_cast %30 : vector<2x1x32xf32> to vector<2x32xf32>
    %32 = vector.extract_strided_slice %28 {offsets = [0, 0], sizes = [2, 32], strides = [1, 1]} : vector<2x33xf32> to vector<2x32xf32>
    %33 = arith.addf %31, %32 : vector<2x32xf32>
    %34 = math.tanh %33 : vector<2x32xf32>
    %cst_11 = arith.constant dense<0.000000e+00> : vector<2x33xf32>
    %35 = tpu.matmul %34, %0, %cst_11 {dimension_numbers = #tpu.dot_dimension_numbers<[1], [0], [0], [1], [0, 0, 1, 1], [], []>} : vector<2x32xf32>, vector<32x33xf32>, vector<2x33xf32> -> vector<2x33xf32>
    %36 = vector.extract_strided_slice %35 {offsets = [0, 32], sizes = [2, 1], strides = [1, 1]} : vector<2x33xf32> to vector<2x1xf32>
    %37 = vector.extract_strided_slice %13 {offsets = [0, 3, 0], sizes = [2, 1, 32], strides = [1, 1, 1]} : vector<2x8x32xf32> to vector<2x1x32xf32>
    %38 = vector.shape_cast %37 : vector<2x1x32xf32> to vector<2x32xf32>
    %39 = vector.extract_strided_slice %35 {offsets = [0, 0], sizes = [2, 32], strides = [1, 1]} : vector<2x33xf32> to vector<2x32xf32>
    %40 = arith.addf %38, %39 : vector<2x32xf32>
    %41 = math.tanh %40 : vector<2x32xf32>
    %cst_12 = arith.constant dense<0.000000e+00> : vector<2x33xf32>
    %42 = tpu.matmul %41, %0, %cst_12 {dimension_numbers = #tpu.dot_dimension_numbers<[1], [0], [0], [1], [0, 0, 1, 1], [], []>} : vector<2x32xf32>, vector<32x33xf32>, vector<2x33xf32> -> vector<2x33xf32>
    %43 = vector.extract_strided_slice %42 {offsets = [0, 32], sizes = [2, 1], strides = [1, 1]} : vector<2x33xf32> to vector<2x1xf32>
    %44 = vector.extract_strided_slice %13 {offsets = [0, 4, 0], sizes = [2, 1, 32], strides = [1, 1, 1]} : vector<2x8x32xf32> to vector<2x1x32xf32>
    %45 = vector.shape_cast %44 : vector<2x1x32xf32> to vector<2x32xf32>
    %46 = vector.extract_strided_slice %42 {offsets = [0, 0], sizes = [2, 32], strides = [1, 1]} : vector<2x33xf32> to vector<2x32xf32>
    %47 = arith.addf %45, %46 : vector<2x32xf32>
    %48 = math.tanh %47 : vector<2x32xf32>
    %cst_13 = arith.constant dense<0.000000e+00> : vector<2x33xf32>
    %49 = tpu.matmul %48, %0, %cst_13 {dimension_numbers = #tpu.dot_dimension_numbers<[1], [0], [0], [1], [0, 0, 1, 1], [], []>} : vector<2x32xf32>, vector<32x33xf32>, vector<2x33xf32> -> vector<2x33xf32>
    %50 = vector.extract_strided_slice %49 {offsets = [0, 32], sizes = [2, 1], strides = [1, 1]} : vector<2x33xf32> to vector<2x1xf32>
    %51 = vector.extract_strided_slice %13 {offsets = [0, 5, 0], sizes = [2, 1, 32], strides = [1, 1, 1]} : vector<2x8x32xf32> to vector<2x1x32xf32>
    %52 = vector.shape_cast %51 : vector<2x1x32xf32> to vector<2x32xf32>
    %53 = vector.extract_strided_slice %49 {offsets = [0, 0], sizes = [2, 32], strides = [1, 1]} : vector<2x33xf32> to vector<2x32xf32>
    %54 = arith.addf %52, %53 : vector<2x32xf32>
    %55 = math.tanh %54 : vector<2x32xf32>
    %cst_14 = arith.constant dense<0.000000e+00> : vector<2x33xf32>
    %56 = tpu.matmul %55, %0, %cst_14 {dimension_numbers = #tpu.dot_dimension_numbers<[1], [0], [0], [1], [0, 0, 1, 1], [], []>} : vector<2x32xf32>, vector<32x33xf32>, vector<2x33xf32> -> vector<2x33xf32>
    %57 = vector.extract_strided_slice %56 {offsets = [0, 32], sizes = [2, 1], strides = [1, 1]} : vector<2x33xf32> to vector<2x1xf32>
    %58 = vector.extract_strided_slice %13 {offsets = [0, 6, 0], sizes = [2, 1, 32], strides = [1, 1, 1]} : vector<2x8x32xf32> to vector<2x1x32xf32>
    %59 = vector.shape_cast %58 : vector<2x1x32xf32> to vector<2x32xf32>
    %60 = vector.extract_strided_slice %56 {offsets = [0, 0], sizes = [2, 32], strides = [1, 1]} : vector<2x33xf32> to vector<2x32xf32>
    %61 = arith.addf %59, %60 : vector<2x32xf32>
    %62 = math.tanh %61 : vector<2x32xf32>
    %cst_15 = arith.constant dense<0.000000e+00> : vector<2x33xf32>
    %63 = tpu.matmul %62, %0, %cst_15 {dimension_numbers = #tpu.dot_dimension_numbers<[1], [0], [0], [1], [0, 0, 1, 1], [], []>} : vector<2x32xf32>, vector<32x33xf32>, vector<2x33xf32> -> vector<2x33xf32>
    %64 = vector.extract_strided_slice %63 {offsets = [0, 32], sizes = [2, 1], strides = [1, 1]} : vector<2x33xf32> to vector<2x1xf32>
    %65 = vector.extract_strided_slice %13 {offsets = [0, 7, 0], sizes = [2, 1, 32], strides = [1, 1, 1]} : vector<2x8x32xf32> to vector<2x1x32xf32>
    %66 = vector.shape_cast %65 : vector<2x1x32xf32> to vector<2x32xf32>
    %67 = vector.extract_strided_slice %63 {offsets = [0, 0], sizes = [2, 32], strides = [1, 1]} : vector<2x33xf32> to vector<2x32xf32>
    %68 = arith.addf %66, %67 : vector<2x32xf32>
    %69 = math.tanh %68 : vector<2x32xf32>
    %70 = vector.broadcast %3 : vector<1x32xf32> to vector<2x32xf32>
    %71 = arith.mulf %69, %70 : vector<2x32xf32>
    %cst_16 = arith.constant dense<0.000000e+00> : vector<2xf32>
    %72 = vector.multi_reduction <add>, %71, %cst_16 [1] : vector<2x32xf32> to vector<2xf32>
    %73 = vector.shape_cast %72 : vector<2xf32> to vector<2x1xf32>
    %74 = tpu.concatenate %22, %29, %36, %43, %50, %57, %64, %73 in 1 : vector<2x1xf32>, vector<2x1xf32>, vector<2x1xf32>, vector<2x1xf32>, vector<2x1xf32>, vector<2x1xf32>, vector<2x1xf32>, vector<2x1xf32> -> vector<2x8xf32>
    %75 = vector.broadcast %4 : vector<1x1xf32> to vector<2x8xf32>
    %76 = arith.addf %74, %75 : vector<2x8xf32>
    %77 = tpu.concatenate %76, %69 in 1 : vector<2x8xf32>, vector<2x32xf32> -> vector<2x40xf32>
    %c0_17 = arith.constant 0 : index
    %c0_18 = arith.constant 0 : index
    %78 = vector.load %arg3[%c0_17, %c0_18] : memref<2x40xf32, #tpu.memory_space<vmem>>, vector<2x40xf32>
    tpu.vector_store %arg3[%c0_17, %c0_18], %77 {strides = array<i32>} : memref<2x40xf32, #tpu.memory_space<vmem>>, vector<2x40xf32>,
    return
  }
}

</mosaic_0001>

<bundles_post_ra>
// kernel: tpu_custom_call.1
= control target key start
LH: loop header
LB: loop body
LE: loop exit
PB: predicated region body
PF: predicated region fallthrough
CT: control target
= control target key end

     0   :  { %8 = vsyncpa [#allocation3], 0  ;;  %s1311_s0 = inlined_call_operand.hbm [shape: f32[2,8], index: 0, kind: input, shape index: {}]   ;;  %s1312_s1 = inlined_call_operand.hbm [shape: f32[2,32], index: 1, kind: input, shape index: {}]   ;;  %s1313_s2 = inlined_call_operand.hbm [shape: f32[40,33], index: 2, kind: input, shape index: {}]   ;;  %s1314_s3 = inlined_call_operand.hbm [shape: f32[2,40], index: 3, kind: output, shape index: {}]  }
   0x1   :  { %9 = vsyncpa [#allocation6], 0 }
   0x2   :  { %10 = vsyncpa [#allocation4], 0  ;;  %s1138_s12 = smov [#allocation5]   ;;  %s1139_s14 = smov [#allocation2]  }
   0x3   :  { %s27_s13 = sshll.u32 %s1138_s12, 4  ;;  %s17_s15 = sshll.u32 %s1139_s14, 4  ;;  %s28_s13 = int_to_ptr.vmem [resolvable:$true] %s27_s13  ;;  %s18_s15 = int_to_ptr.vmem [resolvable:$true] %s17_s15 }
   0x4   :  { %s1060_s16 = scalar_lea.vmem %s28_s13, 32  ;;  %p1065_p1 = scmp.lt.s32.totalorder %s28_s13, %s28_s13 }
   0x5   :  { %p1061_p0 = scmp.ne.s32.totalorder %s28_s13, %s1060_s16  ;;  %p1066_p2 = scmp.lt.s32.totalorder %s1060_s16, %s1060_s16 }
   0x7   :  { %p1067_p3 = por %p1066_p2, %p1065_p1 }
   0x9   :  { %p1068_p4 = pnand %p1067_p3, %p1061_p0 }
   0xb   :  { %1071 = shalt.err (!%p1068_p4)
}
   0xc   :  { %30 = dma.hbm_to_vmem [thread:$0]  %s1312_s1, 32, %s28_s13, [#allocation6]  }
   0xd   :  { %s1080_s19 = scalar_lea.vmem %s18_s15, 32  ;;  %p1085_p6 = scmp.lt.s32.totalorder %s18_s15, %s18_s15 }
   0xe   :  { %p1081_p5 = scmp.ne.s32.totalorder %s18_s15, %s1080_s19  ;;  %p1086_p7 = scmp.lt.s32.totalorder %s1080_s19, %s1080_s19 }
  0x10   :  { %p1087_p8 = por %p1086_p7, %p1085_p6 }
  0x12   :  { %p1088_p9 = pnand %p1087_p8, %p1081_p5 }
  0x14   :  { %1091 = shalt.err (!%p1088_p9)
}
  0x15   :  { %20 = dma.hbm_to_vmem [thread:$0]  %s1311_s0, 32, %s18_s15, [#allocation3]  }
  0x16   :  { %s1140_s22 = smov [#allocation7]  }
  0x17   :  { %s36_s23 = sshll.u32 %s1140_s22, 4  ;;  %s37_s23 = int_to_ptr.vmem [resolvable:$true] %s36_s23 }
  0x18   :  { %s1100_s24 = scalar_lea.vmem %s37_s23, 640  ;;  %p1105_p11 = scmp.lt.s32.totalorder %s37_s23, %s37_s23 }
  0x19   :  { %p1101_p10 = scmp.ne.s32.totalorder %s37_s23, %s1100_s24  ;;  %p1106_p12 = scmp.lt.s32.totalorder %s1100_s24, %s1100_s24 }
  0x1b   :  { %p1107_p13 = por %p1106_p12, %p1105_p11 }
  0x1d   :  { %p1108_p0 = pnand %p1107_p13, %p1101_p10 }
  0x1f   :  { %1111 = shalt.err (!%p1108_p0)
}
  0x20   :  { %s1141_s1 = smov 128   ;;  %s1142_s25 = smov 8  }
  0x21   :  { %42 = dma.hbm_to_vmem [thread:$0]  %s1313_s2, 640, %s37_s23, [#allocation6], %s1141_s1, %s1141_s1, %s1142_s25  }
  0x22   :  { %1132 = dma.done.wait [#allocation3], 32  }
  0x23   :  { %1133 = vsyncadd [#allocation3], 4294967264 }
  0x24   :  { %1134 = dma.done.wait [#allocation6], 672  }
  0x25   :  { %1135 = vsyncadd [#allocation6], 4294966624  ;;  %v61_v0 = vlaneseq  ;;  %v1143_v1 = vmov 0.0   ;;  %vm1144_vm0 = vmmov 0   ;;  %v1189_v4 = vld [vmem:[#allocation7 + $0x18] sm:$0xff]  ;;  %v1191_v5 = vld [vmem:[#allocation7 + $0x10] sm:$0xff] }
  0x26   :  { %915 = vmatprep.subr.mxu0 %v1143_v1  ;;  %923 = vmatprep.mubr.msk.f32.mxu0 %vm1144_vm0, %v1143_v1  ;;  %v60_v7 = vld [vmem:[#allocation2] sm:$0x3]  ;;  %v1196_v8 = vld [vmem:[#allocation7 + $0x8] sm:$0xff]  ;;  %v1202_v10 = vld [vmem:[#allocation7] sm:$0xff]  ;;  %vm88_vm1 = vcmask 261120   ;;  %vm173_vm2 = vcmask 1041409  }
  0x27   :  { %v62_v2 = vshrl.u32 %v61_v0, 7  ;;  %926 = vmatprep.subr.mxu1 %v1143_v1  ;;  %934 = vmatprep.mubr.msk.f32.mxu1 %vm1144_vm0, %v1143_v1  ;;  %v87_v12 = vld [vmem:[#allocation5] sm:$0x3]  ;;  %v864_v14 = vld [vmem:[#allocation7 + $0x20] ss:$0 sm:$0xff]  ;;  %s1145_s0 = smov 96  }
  0x28   :  { %916 = vmatpush3.msra.mxu0 %v1189_v4  ;;  %927 = vmatpush3.msra.mxu1 %v1189_v4  ;;  %v865_v17 = vld [vmem:[#allocation7 + $0x21] ss:$0 sm:$0xff]  ;;  %s1146_s2 = smov 97   ;;  %s1147_s28 = smov 98   ;;  %vm781_vm3 = vcmask 261127   ;;  %vm785_vm4 = vcmask 253952  }
  0x29   :  { %v70_v3 = vsub.s32 1, %v62_v2  ;;  %v63_v6 = vsub.s32 0, %v62_v2  ;;  %917 = vmatprep.subr.mxu0 %v1143_v1  ;;  %928 = vmatprep.subr.mxu1 %v1143_v1  ;;  %s1148_s29 = smov 99   ;;  %s1149_s30 = smov 100   ;;  %vm817_vm5 = vcmask 7168   ;;  %vm819_vm6 = vcmask 15360  }
  0x2a   :  { %918 = vmatpush3.msra.mxu0 %v1191_v5  ;;  %929 = vmatpush3.msra.mxu1 %v1191_v5  ;;  %s1150_s4 = smov 101   ;;  %s1151_s5 = smov 102   ;;  %vm821_vm7 = vcmask 23552   ;;  %vm823_vm8 = vcmask 31744   ;;  %vm825_vm9 = vcmask 39936   ;;  %vm827_vm10 = vcmask 48128  }
  0x2b   :  { %v71_v9 = vrot.slane %v60_v7, %v70_v3  ;;  %919 = vmatprep.subr.mxu0 %v1143_v1  ;;  %v64_v11 = vrot.slane %v60_v7, %v63_v6  ;;  %930 = vmatprep.subr.mxu1 %v1143_v1  ;;  %vm812_vm11 = vcmask 1040384   ;;  %vm829_vm12 = vcmask 56320   ;;  %s1152_s7 = smov [#allocation8]  }
  0x2c   :  { %920 = vmatpush3.msra.mxu0 %v1196_v8  ;;  %931 = vmatpush3.msra.mxu1 %v1196_v8  ;;  %s854_s8 = sshll.u32 %s1152_s7, 4  ;;  %vm844_vm13 = vcmask 64512   ;;  %vm846_vm14 = vcmask 320512   ;;  %s855_s8 = int_to_ptr.vmem [resolvable:$true] %s854_s8 }
  0x2d   :  { %73 = vbcast.lane.b32.xlu0 %v71_v9, 256  ;;  %921 = vmatprep.subr.mxu0 %v1143_v1  ;;  %s1112_s9 = scalar_lea.vmem %s855_s8, 32  ;;  %p1117_p2 = scmp.lt.s32.totalorder %s855_s8, %s855_s8 }
  0x2e   :  { %922 = vmatpush3.msra.mxu0 %v1202_v10  ;;  %932 = vmatprep.subr.mxu1 %v1143_v1  ;;  %p1113_p1 = scmp.ne.s32.totalorder %s855_s8, %s1112_s9  ;;  %p1118_p3 = scmp.lt.s32.totalorder %s1112_s9, %s1112_s9 }
  0x2f   :  { %924 = vmatmul.mubr.msk.f32.vlgmr.msra.gmra.mxu0 %vm88_vm1, %v87_v12  ;;  %933 = vmatpush3.msra.mxu1 %v1202_v10 }
  0x30   :  { %937 = vmatprep.subr.mxu0 %v1143_v1  ;;  %945 = vmatprep.mubr.msk.f32.mxu0 %vm1144_vm0, %v1143_v1  ;;  %p1119_p4 = por %p1118_p3, %p1117_p2 }
  0x31   :  { %66 = vbcast.lane.b32.xlu0 %v64_v11, 256  ;;  %938 = vmatpush3.msra.mxu0 %v1189_v4 }
  0x32   :  { %939 = vmatprep.subr.mxu0 %v1143_v1  ;;  %948 = vmatprep.subr.mxu1 %v1143_v1  ;;  %p1120_p5 = pnand %p1119_p4, %p1113_p1 }
  0x33   :  { %940 = vmatpush3.msra.mxu0 %v1191_v5 }
  0x34   :  { %941 = vmatprep.subr.mxu0 %v1143_v1 }
  0x35   :  { %942 = vmatpush3.msra.mxu0 %v1196_v8 }
  0x36   :  { %943 = vmatprep.subr.mxu0 %v1143_v1 }
  0x37   :  { %944 = vmatpush3.msra.mxu0 %v1202_v10 }
  0x38   :  { %959 = vmatprep.subr.mxu0 %v1143_v1 }
  0x9f   :  { %v74_v13 = vpop.permute.xlu0 %73 }
  0xa0   :  { %v80_v18 = vmul.f32 %v864_v14, %v74_v13 }
  0xa2   :  { %v1226_v21 = vadd.f32 %v865_v17, %v80_v18 }
  0xa3   :  { %v67_v15 = vpop.permute.xlu0 %66 }
  0xa4   :  { %v79_v16 = vmul.f32 %v864_v14, %v67_v15 }
  0xa6   :  { %v1224_v19 = vadd.f32 %v865_v17, %v79_v16 }
  0xef   :  { %v158_v20 = vpop.f32.mrf.mxu0 }
  0xf0   :  { %v163_v22 = vrot.slane %v158_v20, 1  ;;  %v166_v24 = vadd.f32 %v158_v20, %v1224_v19 }
  0xf1   :  { %v925_v23 = vpop.f32.mrf.mxu0 }
  0xf2   :  { %v167_v25 = vadd.f32 %v163_v22, %v1226_v21 }
  0xf4   :  { %1020 = vtanh.f32 %v167_v25 }
  0xf5   :  { %1022 = vtanh.f32 %v166_v24 }
 0x101   :  { %v1021_v26 = vpop.eup %1020 }
 0x102   :  { %v172_v27 = vrot.slane %v1021_v26, 7  ;;  %v1023_v28 = vpop.eup %1022 }
 0x104   :  { %v174_v29 = vsel %vm173_vm2, %v172_v27, %v1023_v28 }
 0x105   :  { %935 = vmatmul.mubr.msk.f32.vlgmr.msra.gmra.mxu1 %vm88_vm1, %v174_v29 }
 0x106   :  { %949 = vmatpush3.msra.mxu1 %v1189_v4  ;;  %956 = vmatprep.mubr.msk.f32.mxu1 %vm1144_vm0, %v1143_v1 }
 0x107   :  { %950 = vmatprep.subr.mxu1 %v1143_v1 }
 0x108   :  { %951 = vmatpush3.msra.mxu1 %v1191_v5 }
 0x109   :  { %952 = vmatprep.subr.mxu1 %v1143_v1 }
 0x10a   :  { %953 = vmatpush3.msra.mxu1 %v1196_v8 }
 0x10b   :  { %954 = vmatprep.subr.mxu1 %v1143_v1 }
 0x10c   :  { %955 = vmatpush3.msra.mxu1 %v1202_v10 }
 0x10d   :  { %970 = vmatprep.subr.mxu1 %v1143_v1 }
 0x1c5   :  { %v243_v30 = vpop.f32.mrf.mxu1 }
 0x1c6   :  { %v248_v31 = vrot.slane %v243_v30, 7  ;;  %789 = vrot.lane.b32.xlu0 %v243_v30, %s1145_s0  ;;  %v252_v34 = vadd.f32 %v243_v30, %v1226_v21 }
 0x1c7   :  { %v936_v32 = vpop.f32.mrf.mxu1 }
 0x1c8   :  { %v251_v33 = vadd.f32 %v248_v31, %v1224_v19  ;;  %v59_v32 = vld [vmem:[#allocation7 + $0x23] sm:$0x1] }
 0x1c9   :  { %1003 = vpush %v59_v32 }
 0x1ca   :  { %1024 = vtanh.f32 %v251_v33 }
 0x1cb   :  { %1026 = vtanh.f32 %v252_v34 }
 0x1d7   :  { %v1025_v35 = vpop.eup %1024 }
 0x1d8   :  { %v257_v36 = vrot.slane %v1025_v35, 1  ;;  %v1027_v37 = vpop.eup %1026 }
 0x1da   :  { %v258_v38 = vsel %vm173_vm2, %v1027_v37, %v257_v36 }
 0x1db   :  { %946 = vmatmul.mubr.msk.f32.vlgmr.msra.gmra.mxu0 %vm88_vm1, %v258_v38 }
 0x1dc   :  { %960 = vmatpush3.msra.mxu0 %v1189_v4  ;;  %967 = vmatprep.mubr.msk.f32.mxu0 %vm1144_vm0, %v1143_v1 }
 0x1dd   :  { %961 = vmatprep.subr.mxu0 %v1143_v1 }
 0x1de   :  { %962 = vmatpush3.msra.mxu0 %v1191_v5 }
 0x1df   :  { %963 = vmatprep.subr.mxu0 %v1143_v1 }
 0x1e0   :  { %964 = vmatpush3.msra.mxu0 %v1196_v8 }
 0x1e1   :  { %965 = vmatprep.subr.mxu0 %v1143_v1 }
 0x1e2   :  { %966 = vmatpush3.msra.mxu0 %v1202_v10 }
 0x1e3   :  { %981 = vmatprep.subr.mxu0 %v1143_v1 }
 0x1fa   :  { %s1004_s6 = spop %1003 }
 0x29b   :  { %v327_v39 = vpop.f32.mrf.mxu0 }
 0x29c   :  { %v332_v40 = vrot.slane %v327_v39, 6  ;;  %v333_v41 = vrot.slane %v327_v39, 7  ;;  %792 = vrot.lane.b32.xlu1 %v327_v39, %s1146_s2  ;;  %v874_v39 = vld [vmem:[#allocation7 + $0x22] ss:$0 sm:$0xff] }
 0x29d   :  { %v947_v42 = vpop.f32.mrf.mxu0 }
 0x29e   :  { %v336_v43 = vadd.f32 %v332_v40, %v1224_v19  ;;  %v337_v44 = vadd.f32 %v333_v41, %v1226_v21 }
 0x2a0   :  { %1028 = vtanh.f32 %v336_v43 }
 0x2a1   :  { %1030 = vtanh.f32 %v337_v44 }
 0x2ad   :  { %v1029_v45 = vpop.eup %1028 }
 0x2ae   :  { %v1031_v46 = vpop.eup %1030  ;;  %v342_v47 = vrot.slane %v1029_v45, 2 }
 0x2af   :  { %v343_v48 = vrot.slane %v1031_v46, 1 }
 0x2b1   :  { %v344_v49 = vsel %vm173_vm2, %v343_v48, %v342_v47 }
 0x2b2   :  { %957 = vmatmul.mubr.msk.f32.vlgmr.msra.gmra.mxu1 %vm88_vm1, %v344_v49 }
 0x2b3   :  { %971 = vmatpush3.msra.mxu1 %v1189_v4  ;;  %978 = vmatprep.mubr.msk.f32.mxu1 %vm1144_vm0, %v1143_v1 }
 0x2b4   :  { %972 = vmatprep.subr.mxu1 %v1143_v1 }
 0x2b5   :  { %973 = vmatpush3.msra.mxu1 %v1191_v5 }
 0x2b6   :  { %974 = vmatprep.subr.mxu1 %v1143_v1 }
 0x2b7   :  { %975 = vmatpush3.msra.mxu1 %v1196_v8 }
 0x2b8   :  { %976 = vmatprep.subr.mxu1 %v1143_v1 }
 0x2b9   :  { %977 = vmatpush3.msra.mxu1 %v1202_v10 }
 0x2ba   :  { %992 = vmatprep.subr.mxu1 %v1143_v1 }
 0x372   :  { %v413_v50 = vpop.f32.mrf.mxu1 }
 0x373   :  { %v418_v51 = vrot.slane %v413_v50, 5  ;;  %v419_v52 = vrot.slane %v413_v50, 6  ;;  %795 = vrot.lane.b32.xlu0 %v413_v50, %s1147_s28  ;;  %v793_v50 = vpop.permute.xlu1 %792 }
 0x374   :  { %v958_v53 = vpop.f32.mrf.mxu1 }
 0x375   :  { %v422_v54 = vadd.f32 %v418_v51, %v1224_v19  ;;  %v423_v55 = vadd.f32 %v419_v52, %v1226_v21 }
 0x377   :  { %1032 = vtanh.f32 %v422_v54 }
 0x378   :  { %1034 = vtanh.f32 %v423_v55 }
 0x384   :  { %v1033_v56 = vpop.eup %1032 }
 0x385   :  { %v1035_v57 = vpop.eup %1034  ;;  %v428_v58 = vrot.slane %v1033_v56, 3 }
 0x386   :  { %v429_v59 = vrot.slane %v1035_v57, 2 }
 0x388   :  { %v430_v60 = vsel %vm173_vm2, %v429_v59, %v428_v58 }
 0x389   :  { %968 = vmatmul.mubr.msk.f32.vlgmr.msra.gmra.mxu0 %vm88_vm1, %v430_v60 }
 0x38a   :  { %982 = vmatpush3.msra.mxu0 %v1189_v4  ;;  %989 = vmatprep.mubr.msk.f32.mxu0 %vm1144_vm0, %v1143_v1 }
 0x38b   :  { %983 = vmatprep.subr.mxu0 %v1143_v1 }
 0x38c   :  { %984 = vmatpush3.msra.mxu0 %v1191_v5 }
 0x38d   :  { %985 = vmatprep.subr.mxu0 %v1143_v1 }
 0x38e   :  { %986 = vmatpush3.msra.mxu0 %v1196_v8 }
 0x38f   :  { %987 = vmatprep.subr.mxu0 %v1143_v1 }
 0x390   :  { %988 = vmatpush3.msra.mxu0 %v1202_v10 }
 0x449   :  { %v499_v61 = vpop.f32.mrf.mxu0 }
 0x44a   :  { %v504_v62 = vrot.slane %v499_v61, 4  ;;  %v505_v63 = vrot.slane %v499_v61, 5  ;;  %798 = vrot.lane.b32.xlu0 %v499_v61, %s1148_s29 }
 0x44b   :  { %v969_v0 = vpop.f32.mrf.mxu0 }
 0x44c   :  { %v508_v2 = vadd.f32 %v504_v62, %v1224_v19  ;;  %v509_v3 = vadd.f32 %v505_v63, %v1226_v21  ;;  %v833_v0 = vstv %s1004_s6 }
 0x44e   :  { %1036 = vtanh.f32 %v508_v2 }
 0x44f   :  { %1038 = vtanh.f32 %v509_v3 }
 0x45b   :  { %v1037_v6 = vpop.eup %1036 }
 0x45c   :  { %v1039_v7 = vpop.eup %1038  ;;  %v514_v9 = vrot.slane %v1037_v6, 4 }
 0x45d   :  { %v515_v11 = vrot.slane %v1039_v7, 3 }
 0x45f   :  { %v516_v12 = vsel %vm173_vm2, %v515_v11, %v514_v9 }
 0x460   :  { %979 = vmatmul.mubr.msk.f32.vlgmr.msra.gmra.mxu1 %vm88_vm1, %v516_v12 }
 0x461   :  { %993 = vmatpush3.msra.mxu1 %v1189_v4  ;;  %1000 = vmatprep.mubr.msk.f32.mxu1 %vm1144_vm0, %v1143_v1 }
 0x462   :  { %994 = vmatprep.subr.mxu1 %v1143_v1 }
 0x463   :  { %995 = vmatpush3.msra.mxu1 %v1191_v5 }
 0x464   :  { %996 = vmatprep.subr.mxu1 %v1143_v1 }
 0x465   :  { %997 = vmatpush3.msra.mxu1 %v1196_v8 }
 0x466   :  { %998 = vmatprep.subr.mxu1 %v1143_v1 }
 0x467   :  { %999 = vmatpush3.msra.mxu1 %v1202_v10 }
 0x520   :  { %v585_v13 = vpop.f32.mrf.mxu1 }
 0x521   :  { %v590_v14 = vrot.slane %v585_v13, 3  ;;  %v591_v15 = vrot.slane %v585_v13, 4  ;;  %801 = vrot.lane.b32.xlu0 %v585_v13, %s1149_s30 }
 0x522   :  { %v980_v4 = vpop.f32.mrf.mxu1 }
 0x523   :  { %v594_v16 = vadd.f32 %v590_v14, %v1224_v19  ;;  %v595_v17 = vadd.f32 %v591_v15, %v1226_v21 }
 0x525   :  { %1040 = vtanh.f32 %v594_v16 }
 0x526   :  { %1042 = vtanh.f32 %v595_v17 }
 0x532   :  { %v1041_v5 = vpop.eup %1040 }
 0x533   :  { %v1043_v18 = vpop.eup %1042  ;;  %v600_v20 = vrot.slane %v1041_v5, 5 }
 0x534   :  { %v601_v8 = vrot.slane %v1043_v18, 4 }
 0x536   :  { %v602_v1 = vsel %vm173_vm2, %v601_v8, %v600_v20 }
 0x537   :  { %990 = vmatmul.mubr.msk.f32.vlgmr.msra.gmra.mxu0 %vm88_vm1, %v602_v1 }
 0x5f7   :  { %v671_v10 = vpop.f32.mrf.mxu0 }
 0x5f8   :  { %v676_v22 = vrot.slane %v671_v10, 2  ;;  %v677_v23 = vrot.slane %v671_v10, 3  ;;  %804 = vrot.lane.b32.xlu0 %v671_v10, %s1150_s4 }
 0x5f9   :  { %v991_v24 = vpop.f32.mrf.mxu0 }
 0x5fa   :  { %v680_v25 = vadd.f32 %v676_v22, %v1224_v19  ;;  %v681_v26 = vadd.f32 %v677_v23, %v1226_v21 }
 0x5fc   :  { %1044 = vtanh.f32 %v680_v25 }
 0x5fd   :  { %1046 = vtanh.f32 %v681_v26 }
 0x609   :  { %v1045_v27 = vpop.eup %1044 }
 0x60a   :  { %v1047_v28 = vpop.eup %1046  ;;  %v686_v29 = vrot.slane %v1045_v27, 6 }
 0x60b   :  { %v687_v30 = vrot.slane %v1047_v28, 5 }
 0x60d   :  { %v688_v31 = vsel %vm173_vm2, %v687_v30, %v686_v29 }
 0x60e   :  { %1001 = vmatmul.mubr.msk.f32.vlgmr.msra.gmra.mxu1 %vm88_vm1, %v688_v31 }
 0x6ce   :  { %v757_v33 = vpop.f32.mrf.mxu1 }
 0x6cf   :  { %v762_v34 = vrot.slane %v757_v33, 1  ;;  %v763_v35 = vrot.slane %v757_v33, 2 }
 0x6d0   :  { %v1002_v36 = vpop.f32.mrf.mxu1 }
 0x6d1   :  { %v766_v37 = vadd.f32 %v762_v34, %v1224_v19  ;;  %v767_v38 = vadd.f32 %v763_v35, %v1226_v21  ;;  %v790_v21 = vpop.permute.xlu0 %789 }
 0x6d2   :  { %v818_v54 = vsel %vm817_vm5, %v790_v21, %v793_v50 }
 0x6d3   :  { %1048 = vtanh.f32 %v766_v37 }
 0x6d4   :  { %1050 = vtanh.f32 %v767_v38 }
 0x6d5   :  { %v796_v49 = vpop.permute.xlu0 %795 }
 0x6d6   :  { %v820_v56 = vsel %vm819_vm6, %v818_v54, %v796_v49 }
 0x6d9   :  { %v799_v51 = vpop.permute.xlu0 %798 }
 0x6da   :  { %v822_v59 = vsel %vm821_vm7, %v820_v56, %v799_v51 }
 0x6dd   :  { %v802_v53 = vpop.permute.xlu0 %801 }
 0x6de   :  { %v824_v60 = vsel %vm823_vm8, %v822_v59, %v802_v53 }
 0x6e0   :  { %v1049_v40 = vpop.eup %1048 }
 0x6e1   :  { %v1051_v41 = vpop.eup %1050  ;;  %v838_v42 = vrot.slane %v1049_v40, 7  ;;  %v774_v43 = vmul.f32 %v1049_v40, %v874_v39  ;;  %v805_v57 = vpop.permute.xlu0 %804 }
 0x6e2   :  { %v839_v44 = vrot.slane %v1051_v41, 6  ;;  %v775_v45 = vmul.f32 %v1051_v41, %v874_v39  ;;  %v826_v62 = vsel %vm825_vm9, %v824_v60, %v805_v57 }
 0x6e3   :  { %v782_v46 = vsel %vm781_vm3, %v774_v43, 0.0 }
 0x6e4   :  { %v840_v47 = vsel %vm173_vm2, %v839_v44, %v838_v42  ;;  %783 = vadd.xlane.f32.xlu1 %v782_v46  ;;  %v778_v48 = vrot.slane %v775_v45, 7 }
 0x6e5   :  { %841 = vrot.lane.b32.xlu0 %v840_v47, %s1142_s25 }
 0x6e6   :  { %v786_v19 = vsel %vm785_vm4, %v778_v48, 0.0 }
 0x6e8   :  { %787 = vadd.xlane.f32.xlu1 %v786_v19 }
 0x6f9   :  { %807 = vrot.lane.b32.xlu1 %v757_v33, %s1151_s5 }
 0x757   :  { %v842_v9 = vpop.permute.xlu0 %841 }
 0x76d   :  { %v784_v52 = vpop.xlane.xlu1 %783 }
 0x76e   :  { %v813_v61 = vrot.slane %v784_v52, 7 }
 0x771   :  { %v788_v55 = vpop.xlane.xlu1 %787 }
 0x772   :  { %v814_v58 = vrot.slane %v788_v55, 7 }
 0x774   :  { %v815_v3 = vsel %vm812_vm11, %v813_v61, %v814_v58 }
 0x775   :  { %v808_v63 = vpop.permute.xlu1 %807 }
 0x776   :  { %v828_v2 = vsel %vm827_vm10, %v826_v62, %v808_v63 }
 0x777   :  { %v830_v6 = vsel %vm829_vm12, %v828_v2, %v815_v3 }
 0x778   :  { %v835_v7 = vadd.f32 %v833_v0, %v830_v6 }
 0x77a   :  { %v845_v11 = vsel %vm844_vm13, %v835_v7, %v842_v9 }
 0x77b   :  { %847 = vst.msk [vmem:[#allocation8] sm:$0x3] %vm846_vm14, %v845_v11 }
 0x77c   :  { %1123 = shalt.err (!%p1120_p5)
}
 0x77d   :  { %857 = dma.vmem_to_hbm [thread:$0]  %s855_s8, 32, %s1314_s3, [#allocation4]  }
 0x77e   :  { %1136 = dma.done.wait [#allocation4], 32  }
 0x77f   :  { %1137 = vsyncadd [#allocation4], 4294967264 }
 0x780   :  { %861 = vsyncpa [#allocation3], 1 }
 0x781   :  { %862 = vsyncpa [#allocation6], 1 }
 0x782   :  { %863 = vsyncpa [#allocation4], 1 }

</bundles_post_ra>
